<compile_context>
chip_gen: v7x
topology: tpu7x:2x2x1
jax: 0.10.0
libtpu: 0.0.40
codegen_flags: <defaults>
</compile_context>

<pallas_src>
import functools

import jax
import jax.numpy as jnp
from jax import lax
from jax.experimental import pallas as pl
from jax.experimental.pallas import tpu as pltpu


def _round_up(x, m):
    return ((x + m - 1) // m) * m


def _resid_bytes(tb, f, ncls, op, kp):
    """Rough per-grid-step VMEM residency: double-buffered batch tiles +
    constant blocks + (F,F) gram accumulator + ~4 (tb,F) f32 temporaries."""
    fixed = 2 * 4 * (f + op * kp) + 4 * f * f + (2 << 20)
    per_row = 2 * 4 * (ncls + 1 + f) + 4 * 4 * f
    return fixed + per_row * tb


def _pick_batch_tile(b, f, ncls, op, kp, budget):
    b8 = _round_up(b, 8)
    if _resid_bytes(b8, f, ncls, op, kp) <= budget:
        return b8                      # whole batch in one tile (grid == 1)
    fixed = _resid_bytes(0, f, ncls, op, kp)
    per_row = 2 * 4 * (ncls + 1 + f) + 4 * 4 * f
    max_rows = max((budget - fixed) // per_row, 8)
    # 256-multiples keep the gram contraction MXU-dense on v6e/v7x (2x256^2);
    # 128 matches v5e's 4x128^2 MXU; 8 is the last-resort sublane multiple.
    for align in (256, 128, 8):
        tb = (max_rows // align) * align
        if tb >= align:
            return int(tb)
    return 8


def _xmi_loss_kernel(out_ref, tgt_ref, feat_ref, mean_ref, w_ref, res_ref,
                     gram_acc, nll_acc, nv_acc, pl_acc, l_acc, cd_acc, *,
                     b_orig, o_orig, masked, use_bb_gram,
                     w_entropy, w_mi, w_cov, w_ortho, w_l1, w_l2):
    TB, NCLS = out_ref.shape
    _, Fd = feat_ref.shape
    pid = pl.program_id(0)

    # ---------------- init accumulators (first grid step) --------------------
    @pl.when(pid == 0)
    def _init():
        nll_acc[...] = jnp.zeros_like(nll_acc)
        nv_acc[...] = jnp.zeros_like(nv_acc)
        pl_acc[...] = jnp.zeros_like(pl_acc)
        l_acc[...] = jnp.zeros_like(l_acc)
        cd_acc[...] = jnp.zeros_like(cd_acc)
        if not use_bb_gram:
            gram_acc[...] = jnp.zeros_like(gram_acc)

    outp = out_ref[...]          # (TB, NCLS) log-probs
    tgt = tgt_ref[...]           # (TB, 1) int32 (pad rows = -100)
    feat = feat_ref[...]         # (TB, F)

    if masked:
        rows = pid * TB + lax.broadcasted_iota(jnp.int32, (TB, 1), 0)
        row_ok = rows < b_orig
    else:
        row_ok = None

    # ---------------- F.nll_loss(mean, ignore_index=-100) --------------------
    cols = lax.broadcasted_iota(jnp.int32, (TB, NCLS), 1)
    picked = jnp.where(cols == tgt, outp, 0.0)
    valid = (tgt != -100).astype(jnp.float32)
    nll_acc[...] += jnp.sum(picked, keepdims=True)
    nv_acc[...] += jnp.sum(valid, keepdims=True)

    # ---------------- kl_loss(features): one exp, reused ---------------------
    m = jnp.max(feat, axis=1, keepdims=True)
    z = feat - m
    e = jnp.exp(z)                                    # single EUP pass (B*F exps)
    s = jnp.sum(e, axis=1, keepdims=True)
    L = z - jnp.log(s)                                # log_softmax
    P = e * pl.reciprocal(s)                          # softmax, no second exp
    row_pl = jnp.sum(P * L, axis=1, keepdims=True)
    row_l = jnp.sum(L, axis=1, keepdims=True)
    if masked:
        row_pl = jnp.where(row_ok, row_pl, 0.0)
        row_l = jnp.where(row_ok, row_l, 0.0)
    pl_acc[...] += jnp.sum(row_pl, keepdims=True)
    l_acc[...] += jnp.sum(row_l, keepdims=True)

    # ---------------- cov_loss pieces (gram side picked at trace time) -------
    cen = feat - mean_ref[...]
    if masked:
        cen = jnp.where(row_ok, cen, 0.0)
    d = jnp.sum(cen * cen, axis=1, keepdims=True)     # (TB,1) = diag(cen cen^T)
    if use_bb_gram:
        # single tile, B < F: (B,B) gram -> fewer MXU flops, no F^2 buffer.
        g = lax.dot_general(cen, cen, (((1,), (1,)), ((), ())),
                            preferred_element_type=jnp.float32)       # (TB,TB)
        cd_acc[...] += (jnp.sum(g * g, keepdims=True)
                        - jnp.sum(d * d, keepdims=True))
    else:
        # tileable path: accumulate cen^T cen into the (F,F) gram accumulator.
        gram_acc[...] += lax.dot_general(cen, cen, (((0,), (0,)), ((), ())),
                                         preferred_element_type=jnp.float32)
        cd_acc[...] += jnp.sum(d * d, keepdims=True)

    # ---------------- finalize (last grid step) -------------------------------
    @pl.when(pid == pl.num_programs(0) - 1)
    def _finalize():
        # 0/0 -> NaN if every target is ignored (matches PyTorch mean reduction).
        nll = -nll_acc[...] / nv_acc[...]
        kl = (float(Fd) * pl_acc[...] - l_acc[...]) / float(b_orig)
        if use_bb_gram:
            covl = cd_acc[...] / float(b_orig * b_orig)
        else:
            gsum = gram_acc[...]
            covl = (jnp.sum(gsum * gsum, keepdims=True)
                    - cd_acc[...]) / float(b_orig * b_orig)

        # weight losses: weights block is resident (constant index_map).
        w = w_ref[...]
        gram_w = lax.dot_general(w, w, (((1,), (1,)), ((), ())),
                                 preferred_element_type=jnp.float32)
        w_sq = w * w
        sum_w2 = jnp.sum(w_sq, keepdims=True)
        # ||W W^T - I||_F^2 = sum(gram^2) - 2*trace(gram) + O (zero-pad safe).
        ortho = (jnp.sum(gram_w * gram_w, keepdims=True)
                 - 2.0 * sum_w2 + float(o_orig))
        l1 = jnp.sum(jnp.abs(w), keepdims=True)
        l2 = jnp.sum(jnp.sqrt(jnp.sum(w_sq, axis=0, keepdims=True)), keepdims=True)

        total = (w_entropy * nll + w_mi * kl + w_cov * covl
                 + w_ortho * ortho + w_l1 * l1 + w_l2 * l2)

        # Pack all 7 scalars into one lane-dense (1, 128) store.
        lane = lax.broadcasted_iota(jnp.int32, (1, 128), 1)
        packed = jnp.zeros((1, 128), jnp.float32)
        for i, v in enumerate((total, nll, kl, covl, ortho, l1, l2)):
            packed = jnp.where(lane == i, v, packed)
        res_ref[...] = packed


def xmi_loss(output, target, weights, features,
             w_entropy=1.0, w_mi=0.2, w_cov=0.2, w_ortho=0.1, w_l1=0.1, w_l2=0.1,
             batch_tile=None):
    """Pallas implementation of XMILoss.forward. Returns (loss, info_dict)."""
    # ---- glue: flatten conv weight, 2-D targets, f32 everywhere -------------
    w2d = weights.reshape(weights.shape[0], -1) if weights.ndim > 2 else weights
    w2d = w2d.astype(jnp.float32)
    output = output.astype(jnp.float32)
    features = features.astype(jnp.float32)
    tgt2d = target.astype(jnp.int32).reshape(-1, 1)

    O, K = w2d.shape
    Op, Kp = _round_up(O, 8), _round_up(K, 128)
    if (Op, Kp) != (O, K):
        # Zero padding leaves gram / l1 / l2 unchanged; original O feeds the
        # ortho identity constant.
        w2d = jnp.pad(w2d, ((0, Op - O), (0, Kp - K)))

    B, NCLS = output.shape
    _, Fd = features.shape

    # Column mean computed once here (stable centering across batch tiles).
    mean_f = jnp.mean(features, axis=0, keepdims=True)

    # ---- explicit VMEM budget / generation-aware tile size -------------------
    try:
        vmem_cap = int(pltpu.get_tpu_info().vmem_capacity_bytes)
    except Exception:
        vmem_cap = 64 << 20                      # conservative (v7x per-TC)
    budget = max(min(vmem_cap - (12 << 20), 100 << 20), 16 << 20)

    if batch_tile is not None:
        tb = min(max(8, _round_up(int(batch_tile), 8)), _round_up(B, 8))
    else:
        tb = _pick_batch_tile(B, Fd, NCLS, Op, Kp, budget)

    n_tiles = -(-B // tb)
    b_pad = n_tiles * tb
    masked = (b_pad != B)
    if masked:
        output = jnp.pad(output, ((0, b_pad - B), (0, 0)))
        features = jnp.pad(features, ((0, b_pad - B), (0, 0)))
        tgt2d = jnp.pad(tgt2d, ((0, b_pad - B), (0, 0)), constant_values=-100)

    use_bb_gram = (n_tiles == 1) and (tb < Fd)
    gram_shape = (8, 128) if use_bb_gram else (Fd, Fd)

    kernel = functools.partial(
        _xmi_loss_kernel, b_orig=B, o_orig=O, masked=masked,
        use_bb_gram=use_bb_gram,
        w_entropy=float(w_entropy), w_mi=float(w_mi), w_cov=float(w_cov),
        w_ortho=float(w_ortho), w_l1=float(w_l1), w_l2=float(w_l2))

    grid_spec = pltpu.PrefetchScalarGridSpec(
        num_scalar_prefetch=0,
        grid=(n_tiles,),
        in_specs=[
            pl.BlockSpec((tb, NCLS), lambda i: (i, 0)),     # output (tiled)
            pl.BlockSpec((tb, 1), lambda i: (i, 0)),        # target (tiled)
            pl.BlockSpec((tb, Fd), lambda i: (i, 0)),       # features (tiled)
            pl.BlockSpec((1, Fd), lambda i: (0, 0)),        # mean (constant)
            pl.BlockSpec((Op, Kp), lambda i: (0, 0)),       # weights (constant)
        ],
        out_specs=pl.BlockSpec((1, 128), lambda i: (0, 0)),
        scratch_shapes=[
            pltpu.VMEM(gram_shape, jnp.float32),            # (F,F) gram accumulator
            pltpu.VMEM((1, 1), jnp.float32),                # sum(log p[target])
            pltpu.VMEM((1, 1), jnp.float32),                # n_valid
            pltpu.VMEM((1, 1), jnp.float32),                # sum(P*L)
            pltpu.VMEM((1, 1), jnp.float32),                # sum(L)
            pltpu.VMEM((1, 1), jnp.float32),                # sum(d^2) / cov numerator
        ])

    mm_flops = (2 * b_pad * b_pad * Fd) if use_bb_gram else (2 * b_pad * Fd * Fd)
    cost = pl.CostEstimate(
        flops=int(mm_flops + 2 * Op * Op * Kp + 16 * b_pad * Fd + 6 * Op * Kp),
        transcendentals=int(b_pad * Fd + b_pad + Kp),
        bytes_accessed=int(4 * (b_pad * (NCLS + 1 + Fd) + Fd + Op * Kp) + 4 * 128))

    vmem_limit = int(min(max(budget, _resid_bytes(tb, Fd, NCLS, Op, Kp) + (4 << 20)),
                         vmem_cap - (4 << 20)))

    packed = pl.pallas_call(
        kernel,
        out_shape=jax.ShapeDtypeStruct((1, 128), jnp.float32),
        grid_spec=grid_spec,
        compiler_params=pltpu.CompilerParams(
            dimension_semantics=("arbitrary",),             # batch axis is a reduction
            vmem_limit_bytes=vmem_limit),
        cost_estimate=cost,
    )(output, tgt2d, features, mean_f, w2d)

    def _sel(wgt, val):
        # Match PyTorch: a component with zero weight reports exactly 0.0.
        return val if float(wgt) != 0.0 else jnp.zeros((), jnp.float32)

    total = packed[0, 0]
    info = {'nll_loss': _sel(w_entropy, packed[0, 1]),
            'kl_loss': _sel(w_mi, packed[0, 2]),
            'cov_loss': _sel(w_cov, packed[0, 3]),
            'ortho_loss': _sel(w_ortho, packed[0, 4]),
            'l1_loss': _sel(w_l1, packed[0, 5]),
            'l2_loss': _sel(w_l2, packed[0, 6])}
    return total, info


if __name__ == "__main__":
    key = jax.random.PRNGKey(0)
    k1, k2, k3, k4, k5, k6 = jax.random.split(key, 6)

    # ---- Config A: demo shapes -> single tile, (B,B)-gram path (B < F) ------
    B, NCLS, FD = 8, 4, 16          # batch, num classes, feature channels
    O, CI, KH, KW = 8, 4, 3, 3      # conv-style weight shape
    logits = jax.random.normal(k1, (B, NCLS), dtype=jnp.float32)
    output = jax.nn.log_softmax(logits, axis=-1)            # log-probs for NLL
    target = jax.random.randint(k2, (B,), 0, NCLS)
    weights = 0.1 * jax.random.normal(k3, (O, CI, KH, KW), dtype=jnp.float32)
    features = jax.random.normal(k4, (B, FD), dtype=jnp.float32)
    loss_a, info_a = xmi_loss(output, target, weights, features)
    jax.block_until_ready(loss_a)
    jax.block_until_ready(info_a)

    # ---- Config B: force the batch-tiled grid (3 steps), (F,F) accumulator
    # and the padded-row masking path (B=20 -> padded to 24, tile of 8) -------
    B2, FD2 = 20, 8
    logits2 = jax.random.normal(k5, (B2, NCLS), dtype=jnp.float32)
    output2 = jax.nn.log_softmax(logits2, axis=-1)
    target2 = jax.random.randint(k6, (B2,), 0, NCLS)
    features2 = jax.random.normal(k1, (B2, FD2), dtype=jnp.float32)
    loss_b, info_b = xmi_loss(output2, target2, weights, features2, batch_tile=8)
    jax.block_until_ready(loss_b)
    jax.block_until_ready(info_b)

    print("KERNEL_OK")
</pallas_src>

<mosaic_0001>
module attributes {stable_mosaic.version = 11 : i64} {
  func.func @_xmi_loss_kernel(%arg0: i32, %arg1: memref<8x4xf32, #tpu.memory_space<vmem>>, %arg2: memref<8x1xi32, #tpu.memory_space<vmem>>, %arg3: memref<8x16xf32, #tpu.memory_space<vmem>>, %arg4: memref<1x16xf32, #tpu.memory_space<vmem>>, %arg5: memref<8x128xf32, #tpu.memory_space<vmem>>, %arg6: memref<1x128xf32, #tpu.memory_space<vmem>>, %arg7: memref<8x128xf32, #tpu.memory_space<vmem>>, %arg8: memref<1x1xf32, #tpu.memory_space<vmem>>, %arg9: memref<1x1xf32, #tpu.memory_space<vmem>>, %arg10: memref<1x1xf32, #tpu.memory_space<vmem>>, %arg11: memref<1x1xf32, #tpu.memory_space<vmem>>, %arg12: memref<1x1xf32, #tpu.memory_space<vmem>>) attributes {dimension_semantics = [#tpu.dimension_semantics<arbitrary>], iteration_bounds = array<i64: 1>, scalar_prefetch = 0 : i64, scratch_operands = 6 : i64, tpu.core_type = #tpu.core_type<tc>, window_params = [{transform_indices = @transform_0, window_bounds = array<i64: 8, 4>}, {transform_indices = @transform_1, window_bounds = array<i64: 8, 1>}, {transform_indices = @transform_2, window_bounds = array<i64: 8, 16>}, {pipeline_mode = #tpu.pipeline_mode<synchronous>, transform_indices = @transform_3, window_bounds = array<i64: 1, 16>}, {pipeline_mode = #tpu.pipeline_mode<synchronous>, transform_indices = @transform_4, window_bounds = array<i64: 8, 128>}, {pipeline_mode = #tpu.pipeline_mode<synchronous>, transform_indices = @transform_5, window_bounds = array<i64: 1, 128>}]} {
    %c0_i32 = arith.constant 0 : i32
    %0 = arith.cmpi eq, %arg0, %c0_i32 : i32
    %1 = arith.extui %0 : i1 to i32
    %c0_i32_0 = arith.constant 0 : i32
    %2 = arith.cmpi ne, %1, %c0_i32_0 : i32
    scf.if %2 {
      %cst_42 = arith.constant 0.000000e+00 : f32
      %91 = vector.broadcast %cst_42 : f32 to vector<1x1xf32>
      %c0_43 = arith.constant 0 : index
      %c0_44 = arith.constant 0 : index
      %92 = vector.load %arg8[%c0_43, %c0_44] : memref<1x1xf32, #tpu.memory_space<vmem>>, vector<1x1xf32>
      tpu.vector_store %arg8[%c0_43, %c0_44], %91 {strides = array<i32>} : memref<1x1xf32, #tpu.memory_space<vmem>>, vector<1x1xf32>,
      %cst_45 = arith.constant 0.000000e+00 : f32
      %93 = vector.broadcast %cst_45 : f32 to vector<1x1xf32>
      %c0_46 = arith.constant 0 : index
      %c0_47 = arith.constant 0 : index
      %94 = vector.load %arg9[%c0_46, %c0_47] : memref<1x1xf32, #tpu.memory_space<vmem>>, vector<1x1xf32>
      tpu.vector_store %arg9[%c0_46, %c0_47], %93 {strides = array<i32>} : memref<1x1xf32, #tpu.memory_space<vmem>>, vector<1x1xf32>,
      %cst_48 = arith.constant 0.000000e+00 : f32
      %95 = vector.broadcast %cst_48 : f32 to vector<1x1xf32>
      %c0_49 = arith.constant 0 : index
      %c0_50 = arith.constant 0 : index
      %96 = vector.load %arg10[%c0_49, %c0_50] : memref<1x1xf32, #tpu.memory_space<vmem>>, vector<1x1xf32>
      tpu.vector_store %arg10[%c0_49, %c0_50], %95 {strides = array<i32>} : memref<1x1xf32, #tpu.memory_space<vmem>>, vector<1x1xf32>,
      %cst_51 = arith.constant 0.000000e+00 : f32
      %97 = vector.broadcast %cst_51 : f32 to vector<1x1xf32>
      %c0_52 = arith.constant 0 : index
      %c0_53 = arith.constant 0 : index
      %98 = vector.load %arg11[%c0_52, %c0_53] : memref<1x1xf32, #tpu.memory_space<vmem>>, vector<1x1xf32>
      tpu.vector_store %arg11[%c0_52, %c0_53], %97 {strides = array<i32>} : memref<1x1xf32, #tpu.memory_space<vmem>>, vector<1x1xf32>,
      %cst_54 = arith.constant 0.000000e+00 : f32
      %99 = vector.broadcast %cst_54 : f32 to vector<1x1xf32>
      %c0_55 = arith.constant 0 : index
      %c0_56 = arith.constant 0 : index
      %100 = vector.load %arg12[%c0_55, %c0_56] : memref<1x1xf32, #tpu.memory_space<vmem>>, vector<1x1xf32>
      tpu.vector_store %arg12[%c0_55, %c0_56], %99 {strides = array<i32>} : memref<1x1xf32, #tpu.memory_space<vmem>>, vector<1x1xf32>,
    } else {
    }
    %c0 = arith.constant 0 : index
    %c0_1 = arith.constant 0 : index
    %3 = vector.load %arg1[%c0, %c0_1] : memref<8x4xf32, #tpu.memory_space<vmem>>, vector<8x4xf32>
    %c0_2 = arith.constant 0 : index
    %c0_3 = arith.constant 0 : index
    %4 = vector.load %arg2[%c0_2, %c0_3] : memref<8x1xi32, #tpu.memory_space<vmem>>, vector<8x1xi32>
    %c0_4 = arith.constant 0 : index
    %c0_5 = arith.constant 0 : index
    %5 = vector.load %arg3[%c0_4, %c0_5] : memref<8x16xf32, #tpu.memory_space<vmem>>, vector<8x16xf32>
    %6 = tpu.iota {dimensions = array<i32: 1>} : vector<8x4xi32>
    %7 = vector.broadcast %4 : vector<8x1xi32> to vector<8x4xi32>
    %8 = arith.cmpi eq, %6, %7 : vector<8x4xi32>
    %cst = arith.constant 0.000000e+00 : f32
    %9 = vector.broadcast %cst : f32 to vector<8x4xf32>
    %10 = arith.select %8, %3, %9 : vector<8x4xi1>, vector<8x4xf32>
    %c-100_i32 = arith.constant -100 : i32
    %11 = vector.broadcast %c-100_i32 : i32 to vector<8x1xi32>
    %12 = arith.cmpi ne, %4, %11 : vector<8x1xi32>
    %13 = arith.extui %12 : vector<8x1xi1> to vector<8x1xi32>
    %14 = arith.sitofp %13 : vector<8x1xi32> to vector<8x1xf32>
    %c0_6 = arith.constant 0 : index
    %c0_7 = arith.constant 0 : index
    %15 = vector.load %arg8[%c0_6, %c0_7] : memref<1x1xf32, #tpu.memory_space<vmem>>, vector<1x1xf32>
    %16 = vector.shape_cast %10 : vector<8x4xf32> to vector<1x8x4xf32>
    %cst_8 = arith.constant dense<0.000000e+00> : vector<1xf32>
    %17 = vector.multi_reduction <add>, %16, %cst_8 [1, 2] : vector<1x8x4xf32> to vector<1xf32>
    %18 = vector.shape_cast %17 : vector<1xf32> to vector<1x1x1xf32>
    %19 = vector.extract %18[0, 0, 0] : f32 from vector<1x1x1xf32>
    %20 = vector.broadcast %19 : f32 to vector<1x1xf32>
    %21 = arith.addf %15, %20 : vector<1x1xf32>
    %c0_9 = arith.constant 0 : index
    %c0_10 = arith.constant 0 : index
    %22 = vector.load %arg8[%c0_9, %c0_10] : memref<1x1xf32, #tpu.memory_space<vmem>>, vector<1x1xf32>
    tpu.vector_store %arg8[%c0_9, %c0_10], %21 {strides = array<i32>} : memref<1x1xf32, #tpu.memory_space<vmem>>, vector<1x1xf32>,
    %c0_11 = arith.constant 0 : index
    %c0_12 = arith.constant 0 : index
    %23 = vector.load %arg9[%c0_11, %c0_12] : memref<1x1xf32, #tpu.memory_space<vmem>>, vector<1x1xf32>
    %24 = vector.shape_cast %14 : vector<8x1xf32> to vector<1x8x1xf32>
    %cst_13 = arith.constant dense<0.000000e+00> : vector<1xf32>
    %25 = vector.multi_reduction <add>, %24, %cst_13 [1, 2] : vector<1x8x1xf32> to vector<1xf32>
    %26 = vector.shape_cast %25 : vector<1xf32> to vector<1x1x1xf32>
    %27 = vector.extract %26[0, 0, 0] : f32 from vector<1x1x1xf32>
    %28 = vector.broadcast %27 : f32 to vector<1x1xf32>
    %29 = arith.addf %23, %28 : vector<1x1xf32>
    %c0_14 = arith.constant 0 : index
    %c0_15 = arith.constant 0 : index
    %30 = vector.load %arg9[%c0_14, %c0_15] : memref<1x1xf32, #tpu.memory_space<vmem>>, vector<1x1xf32>
    tpu.vector_store %arg9[%c0_14, %c0_15], %29 {strides = array<i32>} : memref<1x1xf32, #tpu.memory_space<vmem>>, vector<1x1xf32>,
    %cst_16 = arith.constant dense<0xFF800000> : vector<8xf32>
    %31 = vector.multi_reduction <maximumf>, %5, %cst_16 [1] : vector<8x16xf32> to vector<8xf32>
    %32 = vector.shape_cast %31 : vector<8xf32> to vector<8x1xf32>
    %33 = vector.broadcast %32 : vector<8x1xf32> to vector<8x16xf32>
    %34 = arith.subf %5, %33 : vector<8x16xf32>
    %35 = math.exp %34 : vector<8x16xf32>
    %cst_17 = arith.constant dense<0.000000e+00> : vector<8xf32>
    %36 = vector.multi_reduction <add>, %35, %cst_17 [1] : vector<8x16xf32> to vector<8xf32>
    %37 = vector.shape_cast %36 : vector<8xf32> to vector<8x1xf32>
    %38 = math.log %37 : vector<8x1xf32>
    %39 = vector.broadcast %38 : vector<8x1xf32> to vector<8x16xf32>
    %40 = arith.subf %34, %39 : vector<8x16xf32>
    %41 = tpu.reciprocal %37 : vector<8x1xf32> -> vector<8x1xf32>
    %42 = vector.broadcast %41 : vector<8x1xf32> to vector<8x16xf32>
    %43 = arith.mulf %35, %42 : vector<8x16xf32>
    %44 = arith.mulf %43, %40 : vector<8x16xf32>
    %cst_18 = arith.constant dense<0.000000e+00> : vector<8xf32>
    %45 = vector.multi_reduction <add>, %44, %cst_18 [1] : vector<8x16xf32> to vector<8xf32>
    %46 = vector.shape_cast %45 : vector<8xf32> to vector<8x1xf32>
    %cst_19 = arith.constant dense<0.000000e+00> : vector<8xf32>
    %47 = vector.multi_reduction <add>, %40, %cst_19 [1] : vector<8x16xf32> to vector<8xf32>
    %48 = vector.shape_cast %47 : vector<8xf32> to vector<8x1xf32>
    %c0_20 = arith.constant 0 : index
    %c0_21 = arith.constant 0 : index
    %49 = vector.load %arg10[%c0_20, %c0_21] : memref<1x1xf32, #tpu.memory_space<vmem>>, vector<1x1xf32>
    %50 = vector.shape_cast %46 : vector<8x1xf32> to vector<1x8x1xf32>
    %cst_22 = arith.constant dense<0.000000e+00> : vector<1xf32>
    %51 = vector.multi_reduction <add>, %50, %cst_22 [1, 2] : vector<1x8x1xf32> to vector<1xf32>
    %52 = vector.shape_cast %51 : vector<1xf32> to vector<1x1x1xf32>
    %53 = vector.extract %52[0, 0, 0] : f32 from vector<1x1x1xf32>
    %54 = vector.broadcast %53 : f32 to vector<1x1xf32>
    %55 = arith.addf %49, %54 : vector<1x1xf32>
    %c0_23 = arith.constant 0 : index
    %c0_24 = arith.constant 0 : index
    %56 = vector.load %arg10[%c0_23, %c0_24] : memref<1x1xf32, #tpu.memory_space<vmem>>, vector<1x1xf32>
    tpu.vector_store %arg10[%c0_23, %c0_24], %55 {strides = array<i32>} : memref<1x1xf32, #tpu.memory_space<vmem>>, vector<1x1xf32>,
    %c0_25 = arith.constant 0 : index
    %c0_26 = arith.constant 0 : index
    %57 = vector.load %arg11[%c0_25, %c0_26] : memref<1x1xf32, #tpu.memory_space<vmem>>, vector<1x1xf32>
    %58 = vector.shape_cast %48 : vector<8x1xf32> to vector<1x8x1xf32>
    %cst_27 = arith.constant dense<0.000000e+00> : vector<1xf32>
    %59 = vector.multi_reduction <add>, %58, %cst_27 [1, 2] : vector<1x8x1xf32> to vector<1xf32>
    %60 = vector.shape_cast %59 : vector<1xf32> to vector<1x1x1xf32>
    %61 = vector.extract %60[0, 0, 0] : f32 from vector<1x1x1xf32>
    %62 = vector.broadcast %61 : f32 to vector<1x1xf32>
    %63 = arith.addf %57, %62 : vector<1x1xf32>
    %c0_28 = arith.constant 0 : index
    %c0_29 = arith.constant 0 : index
    %64 = vector.load %arg11[%c0_28, %c0_29] : memref<1x1xf32, #tpu.memory_space<vmem>>, vector<1x1xf32>
    tpu.vector_store %arg11[%c0_28, %c0_29], %63 {strides = array<i32>} : memref<1x1xf32, #tpu.memory_space<vmem>>, vector<1x1xf32>,
    %c0_30 = arith.constant 0 : index
    %c0_31 = arith.constant 0 : index
    %65 = vector.load %arg4[%c0_30, %c0_31] : memref<1x16xf32, #tpu.memory_space<vmem>>, vector<1x16xf32>
    %66 = vector.broadcast %65 : vector<1x16xf32> to vector<8x16xf32>
    %67 = arith.subf %5, %66 : vector<8x16xf32>
    %68 = arith.mulf %67, %67 : vector<8x16xf32>
    %cst_32 = arith.constant dense<0.000000e+00> : vector<8xf32>
    %69 = vector.multi_reduction <add>, %68, %cst_32 [1] : vector<8x16xf32> to vector<8xf32>
    %70 = vector.shape_cast %69 : vector<8xf32> to vector<8x1xf32>
    %cst_33 = arith.constant dense<0.000000e+00> : vector<8x8xf32>
    %71 = tpu.matmul %67, %67, %cst_33 {dimension_numbers = #tpu.dot_dimension_numbers<[1], [1], [0], [0], [0, 0, 1, 0], [], []>} : vector<8x16xf32>, vector<8x16xf32>, vector<8x8xf32> -> vector<8x8xf32>
    %c0_34 = arith.constant 0 : index
    %c0_35 = arith.constant 0 : index
    %72 = vector.load %arg12[%c0_34, %c0_35] : memref<1x1xf32, #tpu.memory_space<vmem>>, vector<1x1xf32>
    %73 = arith.mulf %71, %71 : vector<8x8xf32>
    %74 = vector.shape_cast %73 : vector<8x8xf32> to vector<1x8x8xf32>
    %cst_36 = arith.constant dense<0.000000e+00> : vector<1xf32>
    %75 = vector.multi_reduction <add>, %74, %cst_36 [1, 2] : vector<1x8x8xf32> to vector<1xf32>
    %76 = vector.shape_cast %75 : vector<1xf32> to vector<1x1x1xf32>
    %77 = vector.extract %76[0, 0, 0] : f32 from vector<1x1x1xf32>
    %78 = vector.broadcast %77 : f32 to vector<1x1xf32>
    %79 = arith.mulf %70, %70 : vector<8x1xf32>
    %80 = vector.shape_cast %79 : vector<8x1xf32> to vector<1x8x1xf32>
    %cst_37 = arith.constant dense<0.000000e+00> : vector<1xf32>
    %81 = vector.multi_reduction <add>, %80, %cst_37 [1, 2] : vector<1x8x1xf32> to vector<1xf32>
    %82 = vector.shape_cast %81 : vector<1xf32> to vector<1x1x1xf32>
    %83 = vector.extract %82[0, 0, 0] : f32 from vector<1x1x1xf32>
    %84 = vector.broadcast %83 : f32 to vector<1x1xf32>
    %85 = arith.subf %78, %84 : vector<1x1xf32>
    %86 = arith.addf %72, %85 : vector<1x1xf32>
    %c0_38 = arith.constant 0 : index
    %c0_39 = arith.constant 0 : index
    %87 = vector.load %arg12[%c0_38, %c0_39] : memref<1x1xf32, #tpu.memory_space<vmem>>, vector<1x1xf32>
    tpu.vector_store %arg12[%c0_38, %c0_39], %86 {strides = array<i32>} : memref<1x1xf32, #tpu.memory_space<vmem>>, vector<1x1xf32>,
    %c0_i32_40 = arith.constant 0 : i32
    %88 = arith.cmpi eq, %arg0, %c0_i32_40 : i32
    %89 = arith.extui %88 : i1 to i32
    %c0_i32_41 = arith.constant 0 : i32
    %90 = arith.cmpi ne, %89, %c0_i32_41 : i32
    scf.if %90 {
      %c0_42 = arith.constant 0 : index
      %c0_43 = arith.constant 0 : index
      %91 = vector.load %arg8[%c0_42, %c0_43] : memref<1x1xf32, #tpu.memory_space<vmem>>, vector<1x1xf32>
      %cst_44 = arith.constant 0.000000e+00 : f32
      %92 = vector.broadcast %cst_44 : f32 to vector<1x1xf32>
      %93 = arith.subf %92, %91 : vector<1x1xf32>
      %c0_45 = arith.constant 0 : index
      %c0_46 = arith.constant 0 : index
      %94 = vector.load %arg9[%c0_45, %c0_46] : memref<1x1xf32, #tpu.memory_space<vmem>>, vector<1x1xf32>
      %95 = arith.divf %93, %94 : vector<1x1xf32>
      %c0_47 = arith.constant 0 : index
      %c0_48 = arith.constant 0 : index
      %96 = vector.load %arg10[%c0_47, %c0_48] : memref<1x1xf32, #tpu.memory_space<vmem>>, vector<1x1xf32>
      %cst_49 = arith.constant 1.600000e+01 : f32
      %97 = vector.broadcast %cst_49 : f32 to vector<1x1xf32>
      %98 = arith.mulf %97, %96 : vector<1x1xf32>
      %c0_50 = arith.constant 0 : index
      %c0_51 = arith.constant 0 : index
      %99 = vector.load %arg11[%c0_50, %c0_51] : memref<1x1xf32, #tpu.memory_space<vmem>>, vector<1x1xf32>
      %100 = arith.subf %98, %99 : vector<1x1xf32>
      %cst_52 = arith.constant 8.000000e+00 : f32
      %101 = vector.broadcast %cst_52 : f32 to vector<1x1xf32>
      %102 = arith.divf %100, %101 : vector<1x1xf32>
      %c0_53 = arith.constant 0 : index
      %c0_54 = arith.constant 0 : index
      %103 = vector.load %arg12[%c0_53, %c0_54] : memref<1x1xf32, #tpu.memory_space<vmem>>, vector<1x1xf32>
      %cst_55 = arith.constant 6.400000e+01 : f32
      %104 = vector.broadcast %cst_55 : f32 to vector<1x1xf32>
      %105 = arith.divf %103, %104 : vector<1x1xf32>
      %c0_56 = arith.constant 0 : index
      %c0_57 = arith.constant 0 : index
      %106 = vector.load %arg5[%c0_56, %c0_57] : memref<8x128xf32, #tpu.memory_space<vmem>>, vector<8x128xf32>
      %cst_58 = arith.constant dense<0.000000e+00> : vector<8x8xf32>
      %107 = tpu.matmul %106, %106, %cst_58 {dimension_numbers = #tpu.dot_dimension_numbers<[1], [1], [0], [0], [0, 0, 1, 0], [], []>} : vector<8x128xf32>, vector<8x128xf32>, vector<8x8xf32> -> vector<8x8xf32>
      %108 = arith.mulf %106, %106 : vector<8x128xf32>
      %109 = vector.shape_cast %108 : vector<8x128xf32> to vector<1x8x128xf32>
      %cst_59 = arith.constant dense<0.000000e+00> : vector<1xf32>
      %110 = vector.multi_reduction <add>, %109, %cst_59 [1, 2] : vector<1x8x128xf32> to vector<1xf32>
      %111 = vector.shape_cast %110 : vector<1xf32> to vector<1x1x1xf32>
      %112 = vector.extract %111[0, 0, 0] : f32 from vector<1x1x1xf32>
      %113 = vector.broadcast %112 : f32 to vector<1x1xf32>
      %114 = arith.mulf %107, %107 : vector<8x8xf32>
      %115 = vector.shape_cast %114 : vector<8x8xf32> to vector<1x8x8xf32>
      %cst_60 = arith.constant dense<0.000000e+00> : vector<1xf32>
      %116 = vector.multi_reduction <add>, %115, %cst_60 [1, 2] : vector<1x8x8xf32> to vector<1xf32>
      %117 = vector.shape_cast %116 : vector<1xf32> to vector<1x1x1xf32>
      %118 = vector.extract %117[0, 0, 0] : f32 from vector<1x1x1xf32>
      %119 = vector.broadcast %118 : f32 to vector<1x1xf32>
      %cst_61 = arith.constant 2.000000e+00 : f32
      %120 = vector.broadcast %cst_61 : f32 to vector<1x1xf32>
      %121 = arith.mulf %120, %113 : vector<1x1xf32>
      %122 = arith.subf %119, %121 : vector<1x1xf32>
      %cst_62 = arith.constant 8.000000e+00 : f32
      %123 = vector.broadcast %cst_62 : f32 to vector<1x1xf32>
      %124 = arith.addf %122, %123 : vector<1x1xf32>
      %125 = math.absf %106 : vector<8x128xf32>
      %126 = vector.shape_cast %125 : vector<8x128xf32> to vector<1x8x128xf32>
      %cst_63 = arith.constant dense<0.000000e+00> : vector<1xf32>
      %127 = vector.multi_reduction <add>, %126, %cst_63 [1, 2] : vector<1x8x128xf32> to vector<1xf32>
      %128 = vector.shape_cast %127 : vector<1xf32> to vector<1x1x1xf32>
      %129 = vector.extract %128[0, 0, 0] : f32 from vector<1x1x1xf32>
      %130 = vector.broadcast %129 : f32 to vector<1x1xf32>
      %cst_64 = arith.constant dense<0.000000e+00> : vector<128xf32>
      %131 = vector.multi_reduction <add>, %108, %cst_64 [0] : vector<8x128xf32> to vector<128xf32>
      %132 = vector.shape_cast %131 : vector<128xf32> to vector<1x128xf32>
      %133 = math.sqrt %132 : vector<1x128xf32>
      %134 = vector.shape_cast %133 : vector<1x128xf32> to vector<1x1x128xf32>
      %cst_65 = arith.constant dense<0.000000e+00> : vector<1xf32>
      %135 = vector.multi_reduction <add>, %134, %cst_65 [1, 2] : vector<1x1x128xf32> to vector<1xf32>
      %136 = vector.shape_cast %135 : vector<1xf32> to vector<1x1x1xf32>
      %137 = vector.extract %136[0, 0, 0] : f32 from vector<1x1x1xf32>
      %138 = vector.broadcast %137 : f32 to vector<1x1xf32>
      %cst_66 = arith.constant 1.000000e+00 : f32
      %139 = vector.broadcast %cst_66 : f32 to vector<1x1xf32>
      %140 = arith.mulf %139, %95 : vector<1x1xf32>
      %cst_67 = arith.constant 2.000000e-01 : f32
      %141 = vector.broadcast %cst_67 : f32 to vector<1x1xf32>
      %142 = arith.mulf %141, %102 : vector<1x1xf32>
      %143 = arith.addf %140, %142 : vector<1x1xf32>
      %cst_68 = arith.constant 2.000000e-01 : f32
      %144 = vector.broadcast %cst_68 : f32 to vector<1x1xf32>
      %145 = arith.mulf %144, %105 : vector<1x1xf32>
      %146 = arith.addf %143, %145 : vector<1x1xf32>
      %cst_69 = arith.constant 1.000000e-01 : f32
      %147 = vector.broadcast %cst_69 : f32 to vector<1x1xf32>
      %148 = arith.mulf %147, %124 : vector<1x1xf32>
      %149 = arith.addf %146, %148 : vector<1x1xf32>
      %cst_70 = arith.constant 1.000000e-01 : f32
      %150 = vector.broadcast %cst_70 : f32 to vector<1x1xf32>
      %151 = arith.mulf %150, %130 : vector<1x1xf32>
      %152 = arith.addf %149, %151 : vector<1x1xf32>
      %cst_71 = arith.constant 1.000000e-01 : f32
      %153 = vector.broadcast %cst_71 : f32 to vector<1x1xf32>
      %154 = arith.mulf %153, %138 : vector<1x1xf32>
      %155 = arith.addf %152, %154 : vector<1x1xf32>
      %156 = tpu.iota {dimensions = array<i32: 1>} : vector<1x128xi32>
      %cst_72 = arith.constant 0.000000e+00 : f32
      %157 = vector.broadcast %cst_72 : f32 to vector<1x128xf32>
      %c0_i32_73 = arith.constant 0 : i32
      %158 = vector.broadcast %c0_i32_73 : i32 to vector<1x128xi32>
      %159 = arith.cmpi eq, %156, %158 : vector<1x128xi32>
      %160 = vector.shape_cast %155 : vector<1x1xf32> to vector<1x1xf32>
      %161 = vector.broadcast %160 : vector<1x1xf32> to vector<1x128xf32>
      %162 = arith.select %159, %161, %157 : vector<1x128xi1>, vector<1x128xf32>
      %c1_i32 = arith.constant 1 : i32
      %163 = vector.broadcast %c1_i32 : i32 to vector<1x128xi32>
      %164 = arith.cmpi eq, %156, %163 : vector<1x128xi32>
      %165 = vector.shape_cast %95 : vector<1x1xf32> to vector<1x1xf32>
      %166 = vector.broadcast %165 : vector<1x1xf32> to vector<1x128xf32>
      %167 = arith.select %164, %166, %162 : vector<1x128xi1>, vector<1x128xf32>
      %c2_i32 = arith.constant 2 : i32
      %168 = vector.broadcast %c2_i32 : i32 to vector<1x128xi32>
      %169 = arith.cmpi eq, %156, %168 : vector<1x128xi32>
      %170 = vector.shape_cast %102 : vector<1x1xf32> to vector<1x1xf32>
      %171 = vector.broadcast %170 : vector<1x1xf32> to vector<1x128xf32>
      %172 = arith.select %169, %171, %167 : vector<1x128xi1>, vector<1x128xf32>
      %c3_i32 = arith.constant 3 : i32
      %173 = vector.broadcast %c3_i32 : i32 to vector<1x128xi32>
      %174 = arith.cmpi eq, %156, %173 : vector<1x128xi32>
      %175 = vector.shape_cast %105 : vector<1x1xf32> to vector<1x1xf32>
      %176 = vector.broadcast %175 : vector<1x1xf32> to vector<1x128xf32>
      %177 = arith.select %174, %176, %172 : vector<1x128xi1>, vector<1x128xf32>
      %c4_i32 = arith.constant 4 : i32
      %178 = vector.broadcast %c4_i32 : i32 to vector<1x128xi32>
      %179 = arith.cmpi eq, %156, %178 : vector<1x128xi32>
      %180 = vector.shape_cast %124 : vector<1x1xf32> to vector<1x1xf32>
      %181 = vector.broadcast %180 : vector<1x1xf32> to vector<1x128xf32>
      %182 = arith.select %179, %181, %177 : vector<1x128xi1>, vector<1x128xf32>
      %c5_i32 = arith.constant 5 : i32
      %183 = vector.broadcast %c5_i32 : i32 to vector<1x128xi32>
      %184 = arith.cmpi eq, %156, %183 : vector<1x128xi32>
      %185 = vector.shape_cast %130 : vector<1x1xf32> to vector<1x1xf32>
      %186 = vector.broadcast %185 : vector<1x1xf32> to vector<1x128xf32>
      %187 = arith.select %184, %186, %182 : vector<1x128xi1>, vector<1x128xf32>
      %c6_i32 = arith.constant 6 : i32
      %188 = vector.broadcast %c6_i32 : i32 to vector<1x128xi32>
      %189 = arith.cmpi eq, %156, %188 : vector<1x128xi32>
      %190 = vector.shape_cast %138 : vector<1x1xf32> to vector<1x1xf32>
      %191 = vector.broadcast %190 : vector<1x1xf32> to vector<1x128xf32>
      %192 = arith.select %189, %191, %187 : vector<1x128xi1>, vector<1x128xf32>
      %c0_74 = arith.constant 0 : index
      %c0_75 = arith.constant 0 : index
      %193 = vector.load %arg6[%c0_74, %c0_75] : memref<1x128xf32, #tpu.memory_space<vmem>>, vector<1x128xf32>
      tpu.vector_store %arg6[%c0_74, %c0_75], %192 {strides = array<i32>} : memref<1x128xf32, #tpu.memory_space<vmem>>, vector<1x128xf32>,
    } else {
    }
    return
  }
  func.func @transform_0(%arg0: i32) -> (i32, i32) {
    %c0_i32 = arith.constant 0 : i32
    %c0_i32_0 = arith.constant 0 : i32
    return %arg0, %c0_i32 : i32, i32
  }
  func.func @transform_1(%arg0: i32) -> (i32, i32) {
    %c0_i32 = arith.constant 0 : i32
    %c0_i32_0 = arith.constant 0 : i32
    return %arg0, %c0_i32 : i32, i32
  }
  func.func @transform_2(%arg0: i32) -> (i32, i32) {
    %c0_i32 = arith.constant 0 : i32
    %c0_i32_0 = arith.constant 0 : i32
    return %arg0, %c0_i32 : i32, i32
  }
  func.func @transform_3(%arg0: i32) -> (i32, i32) {
    %c0_i32 = arith.constant 0 : i32
    %c0_i32_0 = arith.constant 0 : i32
    %c0_i32_1 = arith.constant 0 : i32
    return %c0_i32, %c0_i32_0 : i32, i32
  }
  func.func @transform_4(%arg0: i32) -> (i32, i32) {
    %c0_i32 = arith.constant 0 : i32
    %c0_i32_0 = arith.constant 0 : i32
    %c0_i32_1 = arith.constant 0 : i32
    return %c0_i32, %c0_i32_0 : i32, i32
  }
  func.func @transform_5(%arg0: i32) -> (i32, i32) {
    %c0_i32 = arith.constant 0 : i32
    %c0_i32_0 = arith.constant 0 : i32
    %c0_i32_1 = arith.constant 0 : i32
    return %c0_i32, %c0_i32_0 : i32, i32
  }
}

</mosaic_0001>

<bundles_post_ra>
// kernel: tpu_custom_call.1
= control target key start
LH: loop header
LB: loop body
LE: loop exit
PB: predicated region body
PF: predicated region fallthrough
CT: control target
= control target key end

     0   :  { %vm75_vm0 = vcmask 130048   ;;  %s663_s0 = inlined_call_operand.vmem [shape: f32[8,4], index: 0, kind: input, shape index: {}]   ;;  %s664_s1 = inlined_call_operand.vmem [shape: s32[8,1], index: 1, kind: input, shape index: {}]   ;;  %s665_s2 = inlined_call_operand.vmem [shape: f32[8,16], index: 2, kind: input, shape index: {}]   ;;  %s666_s3 = inlined_call_operand.vmem [shape: f32[1,16], index: 3, kind: input, shape index: {}]   ;;  %s667_s4 = inlined_call_operand.vmem [shape: f32[8,128], index: 4, kind: input, shape index: {}]   ;;  %s668_s5 = inlined_call_operand.hbm [shape: f32[1,128], index: 5, kind: output, shape index: {}]  }
   0x1   :  { %v33_v0 = vld [vmem:[%s665_s2] sm:$0xff] }
   0x2   :  { %10 = vsyncpa [#allocation9], 0  ;;  %v76_v1 = vsel %vm75_vm0, %v33_v0, -inf  ;;  %v32_v2 = vld [vmem:[%s664_s1] sm:$0xff]  ;;  %v542_v4 = vmov 0   ;;  %v543_v5 = vmov 0.0   ;;  %v34_v16 = vlaneseq }
   0x3   :  { %77 = vmax.xlane.f32.xlu0 %v76_v1  ;;  %v465_v3 = vld [vmem:[%s666_s3] ss:$0 sm:$0xff]  ;;  %506 = vset.pattern.permute.xlu1 %v542_v4  ;;  %vm544_vm1 = vmmov 0   ;;  %vm45_vm3 = vcmask 31744   ;;  %vm41_vm4 = vcmp.ne.s32.totalorder %v32_v2, 4294967196  ;;  %vm61_vm5 = vcmask 7168  }
   0x4   :  { %472 = vmatprep.subr.mxu0 %v543_v5  ;;  %v132_v6 = vsub.f32 %v33_v0, %v465_v3  ;;  %v590_v7 = vld [vmem:[%s667_s4] sm:$0xff]  ;;  %37 = vperm.xlu1 %506, %v32_v2   ;;  %v601_v20 = vand.u32 127, %v34_v16  ;;  %v464_v32 = vsel %vm41_vm4, 1.0, %v543_v5  ;;  %vm212_vm6 = vcmask 64512   ;;  %s545_s8 = smov [#allocation8]  }
   0x5   :  { %474 = vmatprep.mubr.msk.f32.mxu0 %vm544_vm1, %v543_v5  ;;  %477 = vmatprep.subr.mxu1 %v543_v5  ;;  %v31_v27 = vld [vmem:[%s663_s0] sm:$0xff]  ;;  %v327_v33 = vmul.f32 %v590_v7, %v590_v7  ;;  %v62_v34 = vsel %vm61_vm5, %v464_v32, 0.0  ;;  %vm377_vm9 = vcmask 1040384   ;;  %vm25_vm10 = vcmask 0   ;;  %s456_s9 = sshll.u32 %s545_s8, 4  ;;  %s457_s9 = int_to_ptr.vmem [resolvable:$true] %s456_s9 }
   0x6   :  { %473 = vmatpush3.xpose.msk.msra.mxu0 %vm75_vm0, %v132_v6  ;;  %478 = vmatpush3.xpose.msra.mxu1 %v590_v7  ;;  %v133_v24 = vmul.f32 %v132_v6, %v132_v6  ;;  %26 = vst.msk [vmem:[#allocation3] sm:$0x1] %vm25_vm10, %v543_v5  ;;  %27 = vst.msk [vmem:[#allocation4] sm:$0x1] %vm25_vm10, %v543_v5  ;;  %v353_v2 = vand.u32 2147483647, %v590_v7  ;;  %p523_p1 = scmp.lt.s32.totalorder %s457_s9, %s457_s9 }
   0x7   :  { %479 = vmatprep.mubr.msk.f32.mxu1 %vm544_vm1, %v543_v5  ;;  %507 = vset.pattern.permute.xlu0 %v542_v4  ;;  %v364_v36 = vrot.slane %v327_v33, 4  ;;  %28 = vst.msk [vmem:[#allocation5] sm:$0x1] %vm25_vm10, %v543_v5  ;;  %29 = vst.msk [vmem:[#allocation6] sm:$0x1] %vm25_vm10, %v543_v5  ;;  %vm399_vm11 = vcmp.eq.s32.totalorder %v601_v20, 0 }
   0x8   :  { %v134_v29 = vsel %vm75_vm0, %v133_v24, 0.0  ;;  %30 = vst.msk [vmem:[#allocation7] sm:$0x1] %vm25_vm10, %v543_v5  ;;  %vm410_vm12 = vcmp.eq.s32.totalorder %v601_v20, 1  ;;  %vm421_vm13 = vcmp.eq.s32.totalorder %v601_v20, 2  ;;  %vm432_vm14 = vcmp.eq.s32.totalorder %v601_v20, 3 }
   0x9   :  { %475 = vmatmul.mubr.msk.f32.vlgmr.msra.gmra.mrb[0].mxu0 %vm75_vm0, %v132_v6  ;;  %480 = vmatmul.mubr.f32.vlgmr.msra.gmra.mrb[0].mxu1 %v590_v7  ;;  %v365_v37 = vadd.f32 %v364_v36, %v327_v33  ;;  %vm443_vm15 = vcmp.eq.s32.totalorder %v601_v20, 4  ;;  %vm447_vm1 = vcmp.eq.s32.totalorder %v601_v20, 6  ;;  %s518_s10 = scalar_lea.vmem %s457_s9, 16  ;;  %s522_s11 = scalar_lea.vmem %s457_s9, 32 }
   0xa   :  { %p519_p0 = scmp.ne.s32.totalorder %s457_s9, %s518_s10  ;;  %p524_p2 = scmp.lt.s32.totalorder %s522_s11, %s518_s10 }
   0xb   :  { %v366_v39 = vrot.slane %v365_v37, 2 }
   0xc   :  { %p525_p3 = por %p524_p2, %p523_p1 }
   0xd   :  { %v367_v40 = vadd.f32 %v366_v39, %v365_v37 }
   0xe   :  { %p526_p4 = pnand %p525_p3, %p519_p0 }
   0xf   :  { %v368_v41 = vrot.slane %v367_v40, 1 }
  0x11   :  { %v369_v42 = vadd.f32 %v368_v41, %v367_v40 }
  0x13   :  { %vm372_vm7 = vcmp.eq.f32.partialorder %v369_v42, inf  ;;  %v375_v48 = vand.u32 2147483648, %v369_v42  ;;  %vm374_vm8 = vcmp.eq.f32.partialorder %v369_v42, 0.0 }
  0x83   :  { %v38_v21 = vpop.permute.xlu1 %37 }
  0x84   :  { %vm39_vm2 = vcmp.eq.s32.totalorder %v601_v20, %v38_v21 }
  0x85   :  { %v40_v30 = vsel %vm39_vm2, %v31_v27, 0.0 }
  0x86   :  { %v46_v31 = vsel %vm45_vm3, %v40_v30, 0.0 }
  0x90   :  { %v78_v8 = vpop.xlane.xlu0 %77 }
  0x91   :  { %v79_v9 = vsub.f32 %v33_v0, %v78_v8 }
  0x93   :  { %v80_v10 = vmul.f32 1.442695, %v79_v9 }
  0x95   :  { %508 = vpow2.f32 %v80_v10 }
  0x9f   :  { %v509_v11 = vpop.eup %508 }
  0xa0   :  { %v82_v12 = vsel %vm75_vm0, %v509_v11, 0.0 }
  0xa1   :  { %83 = vadd.xlane.f32.xlu0 %v82_v12  ;;  %v44_v12 = vld [vmem:[#allocation3] sm:$0x1] }
  0xdc   :  { %v206_v13 = vpop.f32.mrb[0].mxu0  ;;  %v323_v43 = vpop.f32.mrb[0].mxu1 }
  0xdd   :  { %v476_v14 = vpop.f32.mrb[1].mxu0  ;;  %v211_v35 = vmul.f32 %v206_v13, %v206_v13  ;;  %v338_v44 = vmul.f32 %v323_v43, %v323_v43  ;;  %v481_v45 = vpop.f32.mrb[1].mxu1 }
  0xdf   :  { %v213_v38 = vsel %vm212_vm6, %v211_v35, 0.0  ;;  %v339_v46 = vsel %vm212_vm6, %v338_v44, 0.0 }
 0x12e   :  { %v84_v15 = vpop.xlane.xlu0 %83 }
 0x12f   :  { %510 = vlog2.f32 %v84_v15 }
 0x130   :  { %512 = vrcp.f32 %v84_v15  ;;  %v60_v15 = vld [vmem:[#allocation4] sm:$0x1] }
 0x131   :  { %514 = vrsqrt.f32 %v369_v42 }
 0x139   :  { %v511_v17 = vpop.eup %510 }
 0x13a   :  { %v513_v18 = vpop.eup %512  ;;  %v86_v19 = vmul.f32 0.6931472, %v511_v17 }
 0x13b   :  { %v89_v23 = vmul.f32 %v513_v18, %v509_v11  ;;  %v515_v47 = vpop.eup %514 }
 0x13c   :  { %v87_v22 = vsub.f32 %v79_v9, %v86_v19  ;;  %v371_v49 = vmul.f32 %v515_v47, %v369_v42 }
 0x13e   :  { %v94_v25 = vsel %vm75_vm0, %v87_v22, 0.0  ;;  %v90_v26 = vmul.f32 %v89_v23, %v87_v22  ;;  %v373_v50 = vsel %vm372_vm7, %v369_v42, %v371_v49 }
 0x13f   :  { %95 = vadd.xlane.f32.xlu0 %v94_v25  ;;  %v376_v51 = vsel %vm374_vm8, %v375_v48, %v373_v50 }
 0x140   :  { %v91_v28 = vsel %vm75_vm0, %v90_v26, 0.0  ;;  %v378_v52 = vsel %vm377_vm9, %v376_v51, 0.0  ;;  %vm445_vm0 = vcmp.eq.s32.totalorder %v601_v20, 5 }
 0x141   :  { %92 = vadd.xlane.f32.xlu1 %v91_v28 }
 0x143   :  { %135 = vadd.xlane.f32.xlu0 %v134_v29 }
 0x145   :  { %340 = vadd.xlane.f32.xlu1 %v339_v46 }
 0x147   :  { %47 = vadd.xlane.f32.xlu0 %v46_v31 }
 0x149   :  { %379 = vadd.xlane.f32.xlu1 %v378_v52 }
 0x14b   :  { %63 = vadd.xlane.f32.xlu0 %v62_v34 }
 0x14f   :  { %214 = vadd.xlane.f32.xlu0 %v213_v38 }
 0x1cc   :  { %v96_v53 = vpop.xlane.xlu0 %95 }
 0x1cd   :  { %v112_v54 = vsel %vm61_vm5, %v96_v53, 0.0 }
 0x1ce   :  { %v93_v55 = vpop.xlane.xlu1 %92  ;;  %113 = vadd.xlane.f32.xlu0 %v112_v54 }
 0x1cf   :  { %v98_v58 = vsel %vm61_vm5, %v93_v55, 0.0 }
 0x1d0   :  { %v136_v56 = vpop.xlane.xlu0 %135 }
 0x1d1   :  { %v224_v57 = vmul.f32 %v136_v56, %v136_v56 }
 0x1d2   :  { %99 = vadd.xlane.f32.xlu0 %v98_v58  ;;  %v341_v26 = vpop.xlane.xlu1 %340 }
 0x1d3   :  { %v225_v59 = vsel %vm61_vm5, %v224_v57, 0.0  ;;  %v342_v30 = vrot.slane %v341_v26, 4 }
 0x1d4   :  { %v48_v60 = vpop.xlane.xlu0 %47 }
 0x1d5   :  { %v49_v61 = vrot.slane %v48_v60, 4  ;;  %v343_v37 = vadd.f32 %v342_v30, %v341_v26  ;;  %v210_v26 = vld [vmem:[#allocation7] sm:$0x1] }
 0x1d6   :  { %226 = vadd.xlane.f32.xlu0 %v225_v59  ;;  %v380_v32 = vpop.xlane.xlu1 %379 }
 0x1d7   :  { %v50_v62 = vadd.f32 %v49_v61, %v48_v60  ;;  %v381_v38 = vrot.slane %v380_v32, 4  ;;  %v344_v45 = vrot.slane %v343_v37, 2 }
 0x1d8   :  { %v64_v63 = vpop.xlane.xlu0 %63 }
 0x1d9   :  { %v51_v0 = vrot.slane %v50_v62, 2  ;;  %v65_v1 = vrot.slane %v64_v63, 4  ;;  %v382_v46 = vadd.f32 %v381_v38, %v380_v32  ;;  %v345_v56 = vadd.f32 %v344_v45, %v343_v37 }
 0x1da   :  { %328 = vadd.xlane.f32.xlu0 %v327_v33 }
 0x1db   :  { %v66_v3 = vadd.f32 %v65_v1, %v64_v63  ;;  %v52_v4 = vadd.f32 %v51_v0, %v50_v62  ;;  %v383_v55 = vrot.slane %v382_v46, 2 }
 0x1dc   :  { %v215_v24 = vpop.xlane.xlu0 %214 }
 0x1dd   :  { %v67_v5 = vrot.slane %v66_v3, 2  ;;  %v53_v6 = vrot.slane %v52_v4, 1  ;;  %v216_v25 = vrot.slane %v215_v24, 4 }
 0x1de   :  { %354 = vadd.xlane.f32.xlu0 %v353_v2  ;;  %v346_v2 = vrot.slane %v345_v56, 1 }
 0x1df   :  { %v54_v8 = vadd.f32 %v53_v6, %v52_v4  ;;  %v68_v9 = vadd.f32 %v67_v5, %v66_v3  ;;  %v217_v28 = vadd.f32 %v216_v25, %v215_v24  ;;  %v384_v3 = vadd.f32 %v383_v55, %v382_v46 }
 0x1e0   :  { %v406_v55 = vshrl.u32 %v34_v16, 7 }
 0x1e1   :  { %482 = vpush %v54_v8  ;;  %v69_v10 = vrot.slane %v68_v9, 1  ;;  %v218_v34 = vrot.slane %v217_v28, 2 }
 0x1e3   :  { %v70_v11 = vadd.f32 %v69_v10, %v68_v9  ;;  %v219_v44 = vadd.f32 %v218_v34, %v217_v28  ;;  %v347_v10 = vadd.f32 %v346_v2, %v345_v56 }
 0x1e5   :  { %484 = vpush %v70_v11  ;;  %v220_v54 = vrot.slane %v219_v44, 1  ;;  %v385_v11 = vrot.slane %v384_v3, 1 }
 0x1e7   :  { %v221_v63 = vadd.f32 %v220_v54, %v219_v44 }
 0x212   :  { %s483_s0 = spop %482 }
 0x213   :  { %v56_v13 = vstv %s483_s0 }
 0x214   :  { %v57_v14 = vadd.f32 %v56_v13, %v44_v12 }
 0x216   :  { %59 = vst.msk [vmem:[#allocation3] sm:$0x1] %vm25_vm10, %v57_v14  ;;  %s485_s4 = spop %484 }
 0x217   :  { %v72_v7 = vstv %s485_s4 }
 0x218   :  { %v73_v17 = vadd.f32 %v72_v7, %v60_v15  ;;  %v386_v15 = vadd.f32 %v385_v11, %v384_v3 }
 0x21a   :  { %74 = vst.msk [vmem:[#allocation4] sm:$0x1] %vm25_vm10, %v73_v17  ;;  %v97_v17 = vld [vmem:[#allocation5] sm:$0x1] }
 0x21d   :  { %v242_v19 = vld [vmem:[#allocation3] sm:$0x1] }
 0x21e   :  { %v243_v21 = vsub.f32 0.0, %v242_v19 }
 0x221   :  { %v244_v18 = vld [vmem:[#allocation4] sm:$0x1] }
 0x222   :  { %516 = vrcp.f32 %v244_v18  ;;  %v111_v18 = vld [vmem:[#allocation6] sm:$0x1] }
 0x22c   :  { %v517_v22 = vpop.eup %516 }
 0x22d   :  { %v630_v23 = vmul.f32 %v517_v22, %v243_v21 }
 0x22f   :  { %413 = vperm.xlu1 %506, %v630_v23  }
 0x25b   :  { %v114_v27 = vpop.xlane.xlu0 %113 }
 0x25c   :  { %v115_v29 = vrot.slane %v114_v27, 4 }
 0x25e   :  { %v116_v31 = vadd.f32 %v115_v29, %v114_v27 }
 0x25f   :  { %v100_v33 = vpop.xlane.xlu0 %99 }
 0x260   :  { %v117_v35 = vrot.slane %v116_v31, 2  ;;  %v101_v36 = vrot.slane %v100_v33, 4 }
 0x262   :  { %v102_v39 = vadd.f32 %v101_v36, %v100_v33  ;;  %v118_v41 = vadd.f32 %v117_v35, %v116_v31 }
 0x263   :  { %v227_v40 = vpop.xlane.xlu0 %226 }
 0x264   :  { %v103_v42 = vrot.slane %v102_v39, 2  ;;  %v228_v43 = vrot.slane %v227_v40, 4  ;;  %v119_v50 = vrot.slane %v118_v41, 1 }
 0x266   :  { %v229_v47 = vadd.f32 %v228_v43, %v227_v40  ;;  %v104_v48 = vadd.f32 %v103_v42, %v102_v39  ;;  %v120_v60 = vadd.f32 %v119_v50, %v118_v41 }
 0x267   :  { %v329_v49 = vpop.xlane.xlu0 %328 }
 0x268   :  { %v230_v51 = vrot.slane %v229_v47, 2  ;;  %v330_v52 = vrot.slane %v329_v49, 4  ;;  %v105_v53 = vrot.slane %v104_v48, 1 }
 0x26a   :  { %v331_v57 = vadd.f32 %v330_v52, %v329_v49  ;;  %v106_v58 = vadd.f32 %v105_v53, %v104_v48  ;;  %v231_v59 = vadd.f32 %v230_v51, %v229_v47 }
 0x26b   :  { %v355_v61 = vpop.xlane.xlu0 %354 }
 0x26c   :  { %v332_v62 = vrot.slane %v331_v57, 2  ;;  %486 = vpush %v106_v58  ;;  %v356_v0 = vrot.slane %v355_v61, 4  ;;  %v232_v1 = vrot.slane %v231_v59, 1 }
 0x26d   :  { %488 = vpush %v120_v60 }
 0x26e   :  { %490 = vpush %v221_v63  ;;  %v357_v4 = vadd.f32 %v356_v0, %v355_v61  ;;  %v233_v5 = vadd.f32 %v232_v1, %v231_v59  ;;  %v333_v6 = vadd.f32 %v332_v62, %v331_v57 }
 0x270   :  { %v358_v8 = vrot.slane %v357_v4, 2  ;;  %492 = vpush %v233_v5  ;;  %v334_v9 = vrot.slane %v333_v6, 1 }
 0x272   :  { %v335_v12 = vadd.f32 %v334_v9, %v333_v6  ;;  %v359_v13 = vadd.f32 %v358_v8, %v357_v4 }
 0x274   :  { %494 = vpush %v335_v12  ;;  %v360_v14 = vrot.slane %v359_v13, 1 }
 0x275   :  { %496 = vpush %v347_v10 }
 0x276   :  { %v361_v7 = vadd.f32 %v360_v14, %v359_v13 }
 0x278   :  { %498 = vpush %v361_v7 }
 0x279   :  { %500 = vpush %v386_v15 }
 0x29d   :  { %s487_s25 = spop %486 }
 0x29e   :  { %v108_v19 = vstv %s487_s25  ;;  %s489_s26 = spop %488 }
 0x29f   :  { %v109_v21 = vadd.f32 %v108_v19, %v97_v17  ;;  %v122_v22 = vstv %s489_s26  ;;  %s491_s27 = spop %490 }
 0x2a0   :  { %v123_v24 = vadd.f32 %v122_v22, %v111_v18  ;;  %v223_v25 = vstv %s491_s27 }
 0x2a1   :  { %110 = vst.msk [vmem:[#allocation5] sm:$0x1] %vm25_vm10, %v109_v21  ;;  %s493_s28 = spop %492 }
 0x2a2   :  { %124 = vst.msk [vmem:[#allocation6] sm:$0x1] %vm25_vm10, %v123_v24  ;;  %v235_v27 = vstv %s493_s28 }
 0x2a3   :  { %v236_v28 = vsub.f32 %v223_v25, %v235_v27 }
 0x2a5   :  { %v237_v29 = vadd.f32 %v236_v28, %v210_v26  ;;  %s495_s29 = spop %494 }
 0x2a6   :  { %v337_v30 = vstv %s495_s29  ;;  %s497_s30 = spop %496 }
 0x2a7   :  { %238 = vst.msk [vmem:[#allocation7] sm:$0x1] %vm25_vm10, %v237_v29  ;;  %v350_v31 = vmul.f32 2.0, %v337_v30  ;;  %v349_v32 = vstv %s497_s30 }
 0x2a8   :  { %v247_v33 = vld [vmem:[#allocation5] sm:$0x1] }
 0x2a9   :  { %v248_v34 = vmul.f32 16.0, %v247_v33  ;;  %v249_v35 = vld [vmem:[#allocation6] sm:$0x1]  ;;  %v351_v36 = vsub.f32 %v349_v32, %v350_v31  ;;  %s636_s6 = spop %498 }
 0x2aa   :  { %s639_s7 = spop %500  ;;  %v363_v45 = vstv %s636_s6 }
 0x2ab   :  { %v250_v37 = vsub.f32 %v248_v34, %v249_v35  ;;  %v352_v40 = vadd.f32 8.0, %v351_v36  ;;  %v388_v48 = vstv %s639_s7  ;;  %v395_v50 = vmul.f32 0.1, %v363_v45 }
 0x2ac   :  { %v397_v52 = vmul.f32 0.1, %v388_v48 }
 0x2ad   :  { %v252_v38 = vmul.f32 0.125, %v250_v37  ;;  %v393_v46 = vmul.f32 0.1, %v352_v40 }
 0x2ae   :  { %v253_v39 = vld [vmem:[#allocation7] sm:$0x1]  ;;  %v414_v54 = vpop.permute.xlu1 %413 }
 0x2af   :  { %v255_v41 = vmul.f32 0.015625, %v253_v39  ;;  %v389_v42 = vmul.f32 0.2, %v252_v38  ;;  %424 = vperm.xlu1 %506, %v252_v38  }
 0x2b1   :  { %v390_v43 = vadd.f32 %v389_v42, %v630_v23  ;;  %v391_v44 = vmul.f32 0.2, %v255_v41  ;;  %v407_v23 = vsub.s32 0, %v406_v55 }
 0x2b3   :  { %v392_v47 = vadd.f32 %v391_v44, %v390_v43  ;;  %435 = vperm.xlu1 %506, %v255_v41   ;;  %v419_v60 = vrot.slane %v414_v54, %v407_v23 }
 0x2b5   :  { %v394_v49 = vadd.f32 %v393_v46, %v392_v47 }
 0x2b7   :  { %v396_v51 = vadd.f32 %v395_v50, %v394_v49 }
 0x2b9   :  { %v398_v53 = vadd.f32 %v397_v52, %v396_v51 }
 0x2bb   :  { %402 = vperm.xlu0 %507, %v398_v53  }
 0x32e   :  { %v425_v56 = vpop.permute.xlu1 %424 }
 0x32f   :  { %v430_v61 = vrot.slane %v425_v56, %v407_v23 }
 0x332   :  { %v436_v58 = vpop.permute.xlu1 %435 }
 0x333   :  { %v441_v63 = vrot.slane %v436_v58, %v407_v23 }
 0x33a   :  { %v403_v57 = vpop.permute.xlu0 %402 }
 0x33b   :  { %v408_v59 = vrot.slane %v403_v57, %v407_v23 }
 0x33d   :  { %v409_v62 = vsel %vm399_vm11, %v408_v59, 0.0 }
 0x33e   :  { %v420_v0 = vsel %vm410_vm12, %v419_v60, %v409_v62 }
 0x33f   :  { %v431_v16 = vsel %vm421_vm13, %v430_v61, %v420_v0 }
 0x340   :  { %v442_v1 = vsel %vm432_vm14, %v441_v63, %v431_v16 }
 0x341   :  { %v444_v2 = vsel %vm443_vm15, %v352_v40, %v442_v1 }
 0x342   :  { %v446_v3 = vsel %vm445_vm0, %v363_v45, %v444_v2 }
 0x343   :  { %v448_v4 = vsel %vm447_vm1, %v388_v48, %v446_v3 }
 0x344   :  { %449 = vst [vmem:[#allocation8] sm:$0x1] %v448_v4 }
 0x345   :  { %529 = shalt.err (!%p526_p4)
}
 0x346   :  { %s530_s14 = scalar_lea.hbm %s668_s5, 16 }
 0x347   :  { %p531_p5 = scmp.ne.s32.totalorder %s668_s5, %s530_s14  ;;  %p534_p6 = scmp.lt.u32.totalorder %s530_s14, %s668_s5 }
 0x349   :  { %p536_p7 = pnand %p534_p6, %p531_p5 }
 0x34b   :  { %539 = shalt.err (!%p536_p7)
}
 0x34c   :  { %459 = dma.vmem_to_hbm [thread:$0]  %s457_s9, 16, %s668_s5, [#allocation9]  }
 0x34d   :  { %540 = dma.done.wait [#allocation9], 16  }
 0x34e   :  { %541 = vsyncadd [#allocation9], 4294967280 }
 0x34f   :  { %463 = vsyncpa [#allocation9], 1 }

</bundles_post_ra>
